<compile_context>
chip_gen: v7x
topology: tpu7x:2x2x1
jax: 0.10.0
libtpu: 0.0.40
codegen_flags: <defaults>
</compile_context>

<pallas_src>
import functools

import numpy as np

import jax
import jax.numpy as jnp
from jax.experimental import pallas as pl
from jax.experimental.pallas import tpu as pltpu


# ----------------------------------------------------------------------------
# Config (mirrors TimesNet `configs`)
# ----------------------------------------------------------------------------
SEQ_LEN = 16      # configs.seq_len
TOP_K = 2         # configs.top_k
D_MODEL = 4       # configs.d_model
D_FF = 8          # configs.d_ff
NUM_KERNELS = 2   # configs.num_kernels  ->  fused kernel size K = 3


# ----------------------------------------------------------------------------
# Exact (erf-based) GELU usable inside a Mosaic kernel
# ----------------------------------------------------------------------------
def _erf_in_kernel(z):
    # Abramowitz & Stegun 7.1.26 polynomial erf (~1.5e-7 abs error).
    # The 1/(1+p*|z|) divide goes to the EUP via approx reciprocal.
    az = jnp.abs(z)
    t = pl.reciprocal(1.0 + 0.3275911 * az, approx=True)
    poly = ((((1.061405429 * t - 1.453152027) * t + 1.421413741) * t
             - 0.284496736) * t + 0.254829592) * t
    y = 1.0 - poly * jnp.exp(-az * az)
    return jnp.where(z >= 0, y, -y)


def _gelu_in_kernel(x):
    # PyTorch nn.GELU() default (erf-based, not tanh approximation).
    return 0.5 * x * (1.0 + _erf_in_kernel(x * 0.7071067811865476))


# ----------------------------------------------------------------------------
# Parameter construction (deterministic, synthetic)
# ----------------------------------------------------------------------------
def make_inception_params(key, c_in, c_out, num_kernels):
    """Fold Inception_Block_V1 (num_kernels same-padded convs, averaged) into
    one HWIO (K,K,c_in,c_out) conv + (c_out,) bias. Exactly equivalent."""
    K = 2 * num_kernels - 1
    w = jnp.zeros((K, K, c_in, c_out), jnp.float32)
    b = jnp.zeros((c_out,), jnp.float32)
    keys = jax.random.split(key, 2 * num_kernels)
    for i in range(num_kernels):
        s = 2 * i + 1
        off = (K - s) // 2
        wi = 0.1 * jax.random.normal(keys[2 * i], (s, s, c_in, c_out), jnp.float32)
        bi = 0.1 * jax.random.normal(keys[2 * i + 1], (c_out,), jnp.float32)
        w = w.at[off:off + s, off:off + s, :, :].add(wi)
        b = b + bi
    return w / num_kernels, b / num_kernels


def build_period_matmul_params(w1, b1, w2, b2, seq_len):
    """For every FFT bin f (period = seq_len // max(f,1)), fold the same-padded
    KxK conv over the (H=length//period, W=period) image into a dense banded
    matrix acting on the time-flattened vector (length padded to Lmax).

    Returns (m1_all, m2_all, b1_tile, b2_tile) with
      m1_all: (n_freq, Lmax*c_in, Lmax*c_ff)   conv1 as matmul
      m2_all: (n_freq, Lmax*c_ff, Lmax*c_in)   conv2 as matmul
      b*_tile: biases tiled over the Lmax positions.
    Rows/cols for positions >= length are zero, so garbage in the pad region
    never leaks into valid outputs."""
    n_freq = seq_len // 2 + 1
    periods = [seq_len // max(f, 1) for f in range(n_freq)]   # f=0 guarded
    lengths = [(-(-seq_len // p)) * p for p in periods]
    Lmax = max(lengths)

    def banded(w_hwio, period):
        kk = w_hwio.shape[0]
        ci, co = w_hwio.shape[2], w_hwio.shape[3]
        P = kk // 2
        W = period
        H = -(-seq_len // W)
        length = H * W
        w_np = np.asarray(w_hwio, np.float32)
        M = np.zeros((Lmax * ci, Lmax * co), np.float32)
        for t_out in range(length):
            ho, wo = divmod(t_out, W)
            for dh in range(kk):
                hi = ho + dh - P
                if hi < 0 or hi >= H:
                    continue
                for dw in range(kk):
                    wi = wo + dw - P
                    if wi < 0 or wi >= W:
                        continue
                    t_in = hi * W + wi
                    M[t_in * ci:(t_in + 1) * ci,
                      t_out * co:(t_out + 1) * co] = w_np[dh, dw]
        return M

    m1_all = np.stack([banded(w1, p) for p in periods])
    m2_all = np.stack([banded(w2, p) for p in periods])
    b1_tile = np.tile(np.asarray(b1, np.float32).reshape(-1), Lmax)[None, :]
    b2_tile = np.tile(np.asarray(b2, np.float32).reshape(-1), Lmax)[None, :]
    return (jnp.asarray(m1_all), jnp.asarray(m2_all),
            jnp.asarray(b1_tile), jnp.asarray(b2_tile))


# ----------------------------------------------------------------------------
# The fused Pallas kernel: both period branches + weighted combine + residual
# ----------------------------------------------------------------------------
def _make_fused_kernel(k, tn):
    def kernel(x_ref, xp_ref, m1_ref, b1_ref, m2_ref, b2_ref, pw_ref, out_ref):
        # x_ref : (B, T*N)        residual, lane-dense
        # xp_ref: (B, Lmax*N)     time-zero-padded input, lane-dense
        # m1_ref: (k, Lmax*N, Lmax*c_ff)   folded conv1 (per selected period)
        # b1_ref: (1, Lmax*c_ff)
        # m2_ref: (k, Lmax*c_ff, Lmax*N)   folded conv2
        # b2_ref: (1, Lmax*N)
        # pw_ref: (k, B, 1)        softmaxed period weights
        # out_ref: (B, T*N)
        acc = x_ref[...]                       # residual
        xp = xp_ref[...]
        bias1 = b1_ref[...]
        bias2 = b2_ref[...]
        for i in range(k):                     # k is tiny & static
            h = jnp.dot(xp, m1_ref[i], preferred_element_type=jnp.float32) + bias1
            h = _gelu_in_kernel(h)
            z = jnp.dot(h, m2_ref[i], preferred_element_type=jnp.float32) + bias2
            acc = acc + pw_ref[i] * z[:, :tn]  # truncate to seq_len, weight, add
        out_ref[...] = acc
    return kernel


# ----------------------------------------------------------------------------
# End-to-end TimesBlock forward (fully jittable, no host sync)
# ----------------------------------------------------------------------------
@jax.jit
def times_block(x, m1_all, m2_all, b1_tile, b2_tile):
    B, T, N = x.shape
    k = TOP_K
    TN = T * N
    LN = m1_all.shape[1]          # Lmax * d_model

    # ---- FFT_for_Period (traced XLA glue; no device->host round trip) ------
    xf = jnp.fft.rfft(x, axis=1)
    amp = jnp.abs(xf)                                   # (B, T//2+1, N)
    freq = amp.mean(axis=0).mean(axis=-1)
    freq = freq.at[0].set(0.0)
    _, top = jax.lax.top_k(freq, k)                     # (k,) frequency bins
    pw = jax.nn.softmax(jnp.take(amp.mean(axis=-1), top, axis=1), axis=1)  # (B,k)

    # Gather the pre-folded conv matrices for the selected periods.
    m1_sel = jnp.take(m1_all, top, axis=0)              # (k, Lmax*N, Lmax*c_ff)
    m2_sel = jnp.take(m2_all, top, axis=0)              # (k, Lmax*c_ff, Lmax*N)

    # Lane-dense layouts for the kernel.
    x2 = x.reshape(B, TN).astype(jnp.float32)
    if LN > TN:
        xp2 = jnp.concatenate([x2, jnp.zeros((B, LN - TN), jnp.float32)], axis=1)
    else:
        xp2 = x2
    pwk = jnp.transpose(pw).astype(jnp.float32)[:, :, None]     # (k, B, 1)

    out2 = pl.pallas_call(
        _make_fused_kernel(k, TN),
        out_shape=jax.ShapeDtypeStruct((B, TN), jnp.float32),
        in_specs=[pl.BlockSpec(memory_space=pltpu.MemorySpace.VMEM)] * 7,
        out_specs=pl.BlockSpec(memory_space=pltpu.MemorySpace.VMEM),
    )(x2, xp2, m1_sel, b1_tile, m2_sel, b2_tile, pwk)
    return out2.reshape(B, T, N).astype(x.dtype)


# ----------------------------------------------------------------------------
# Pure-JAX reference (sanity check; uses a host sync, test harness only)
# ----------------------------------------------------------------------------
def _reference_times_block(x, w1, b1, w2, b2, top_k=TOP_K):
    B, T, N = x.shape
    xf = jnp.fft.rfft(x, axis=1)
    amp = jnp.abs(xf)
    freq = amp.mean(axis=0).mean(axis=-1)
    freq = freq.at[0].set(0.0)
    _, top = jax.lax.top_k(freq, top_k)
    top = jax.device_get(top)
    pw = jax.nn.softmax(amp.mean(axis=-1)[:, top], axis=1)
    dn = ('NHWC', 'HWIO', 'NHWC')
    res = []
    for i in range(top_k):
        f = int(top[i])
        p = T // max(f, 1)
        length = (-(-T // p)) * p
        xx = x
        if length != T:
            xx = jnp.concatenate([x, jnp.zeros((B, length - T, N), x.dtype)], axis=1)
        img = xx.reshape(B, length // p, p, N)
        h = jax.lax.conv_general_dilated(img, w1, (1, 1), 'SAME',
                                         dimension_numbers=dn) + b1.reshape(1, 1, 1, -1)
        h = 0.5 * h * (1.0 + jax.lax.erf(h * 0.7071067811865476))
        o = jax.lax.conv_general_dilated(h, w2, (1, 1), 'SAME',
                                         dimension_numbers=dn) + b2.reshape(1, 1, 1, -1)
        res.append(o.reshape(B, length, N)[:, :T, :])
    res = jnp.stack(res, axis=-1)
    return jnp.sum(res * pw[:, None, None, :], axis=-1) + x


if __name__ == "__main__":
    key = jax.random.PRNGKey(0)
    kx, k1, k2 = jax.random.split(key, 3)
    B = 2
    x = jax.random.normal(kx, (B, SEQ_LEN, D_MODEL), jnp.float32)

    w1, b1 = make_inception_params(k1, D_MODEL, D_FF, NUM_KERNELS)
    w2, b2 = make_inception_params(k2, D_FF, D_MODEL, NUM_KERNELS)
    # Setup-time weight folding (independent of the data; done once).
    m1_all, m2_all, b1_t, b2_t = build_period_matmul_params(w1, b1, w2, b2, SEQ_LEN)

    out = jax.block_until_ready(times_block(x, m1_all, m2_all, b1_t, b2_t))
    assert out.shape == (B, SEQ_LEN, D_MODEL)

    # TODO(synk): FFT / top-k / softmax period selection stays as XLA glue;
    # there is no clean Pallas FFT primitive.
    ref = jax.block_until_ready(_reference_times_block(x, w1, b1, w2, b2))
    max_err = float(jnp.max(jnp.abs(out - ref)))
    assert max_err < 5e-2, f"max abs err {max_err}"

    print("KERNEL_OK")
</pallas_src>

<mosaic_0001>
module attributes {stable_mosaic.version = 11 : i64} {
  func.func @kernel(%arg0: memref<2x64xf32, #tpu.memory_space<vmem>>, %arg1: memref<2x80xf32, #tpu.memory_space<vmem>>, %arg2: memref<2x80x160xf32, #tpu.memory_space<vmem>>, %arg3: memref<1x160xf32, #tpu.memory_space<vmem>>, %arg4: memref<2x160x80xf32, #tpu.memory_space<vmem>>, %arg5: memref<1x80xf32, #tpu.memory_space<vmem>>, %arg6: memref<2x2x1xf32, #tpu.memory_space<vmem>>, %arg7: memref<2x64xf32, #tpu.memory_space<vmem>>) attributes {dimension_semantics = [], scalar_prefetch = 0 : i64, scratch_operands = 0 : i64, tpu.core_type = #tpu.core_type<tc>} {
    %c0 = arith.constant 0 : index
    %c0_0 = arith.constant 0 : index
    %0 = vector.load %arg0[%c0, %c0_0] : memref<2x64xf32, #tpu.memory_space<vmem>>, vector<2x64xf32>
    %c0_1 = arith.constant 0 : index
    %c0_2 = arith.constant 0 : index
    %1 = vector.load %arg1[%c0_1, %c0_2] : memref<2x80xf32, #tpu.memory_space<vmem>>, vector<2x80xf32>
    %c0_3 = arith.constant 0 : index
    %c0_4 = arith.constant 0 : index
    %2 = vector.load %arg3[%c0_3, %c0_4] : memref<1x160xf32, #tpu.memory_space<vmem>>, vector<1x160xf32>
    %c0_5 = arith.constant 0 : index
    %c0_6 = arith.constant 0 : index
    %3 = vector.load %arg5[%c0_5, %c0_6] : memref<1x80xf32, #tpu.memory_space<vmem>>, vector<1x80xf32>
    %c0_7 = arith.constant 0 : index
    %c0_8 = arith.constant 0 : index
    %c0_9 = arith.constant 0 : index
    %4 = vector.load %arg2[%c0_7, %c0_8, %c0_9] : memref<2x80x160xf32, #tpu.memory_space<vmem>>, vector<1x80x160xf32>
    %5 = vector.shape_cast %4 : vector<1x80x160xf32> to vector<80x160xf32>
    %cst = arith.constant dense<0.000000e+00> : vector<2x160xf32>
    %6 = tpu.matmul %1, %5, %cst {dimension_numbers = #tpu.dot_dimension_numbers<[1], [0], [0], [1], [0, 0, 1, 1], [], []>} : vector<2x80xf32>, vector<80x160xf32>, vector<2x160xf32> -> vector<2x160xf32>
    %7 = vector.broadcast %2 : vector<1x160xf32> to vector<2x160xf32>
    %8 = arith.addf %6, %7 : vector<2x160xf32>
    %cst_10 = arith.constant 5.000000e-01 : f32
    %9 = vector.broadcast %cst_10 : f32 to vector<2x160xf32>
    %10 = arith.mulf %9, %8 : vector<2x160xf32>
    %cst_11 = arith.constant 0.707106769 : f32
    %11 = vector.broadcast %cst_11 : f32 to vector<2x160xf32>
    %12 = arith.mulf %8, %11 : vector<2x160xf32>
    %13 = math.absf %12 : vector<2x160xf32>
    %cst_12 = arith.constant 0.327591091 : f32
    %14 = vector.broadcast %cst_12 : f32 to vector<2x160xf32>
    %15 = arith.mulf %14, %13 : vector<2x160xf32>
    %cst_13 = arith.constant 1.000000e+00 : f32
    %16 = vector.broadcast %cst_13 : f32 to vector<2x160xf32>
    %17 = arith.addf %16, %15 : vector<2x160xf32>
    %18 = tpu.reciprocal %17 {approx = true} : vector<2x160xf32> -> vector<2x160xf32>
    %cst_14 = arith.constant 1.06140542 : f32
    %19 = vector.broadcast %cst_14 : f32 to vector<2x160xf32>
    %20 = arith.mulf %19, %18 : vector<2x160xf32>
    %cst_15 = arith.constant 1.45315206 : f32
    %21 = vector.broadcast %cst_15 : f32 to vector<2x160xf32>
    %22 = arith.subf %20, %21 : vector<2x160xf32>
    %23 = arith.mulf %22, %18 : vector<2x160xf32>
    %cst_16 = arith.constant 1.42141378 : f32
    %24 = vector.broadcast %cst_16 : f32 to vector<2x160xf32>
    %25 = arith.addf %23, %24 : vector<2x160xf32>
    %26 = arith.mulf %25, %18 : vector<2x160xf32>
    %cst_17 = arith.constant 0.284496725 : f32
    %27 = vector.broadcast %cst_17 : f32 to vector<2x160xf32>
    %28 = arith.subf %26, %27 : vector<2x160xf32>
    %29 = arith.mulf %28, %18 : vector<2x160xf32>
    %cst_18 = arith.constant 0.254829586 : f32
    %30 = vector.broadcast %cst_18 : f32 to vector<2x160xf32>
    %31 = arith.addf %29, %30 : vector<2x160xf32>
    %32 = arith.mulf %31, %18 : vector<2x160xf32>
    %cst_19 = arith.constant 0.000000e+00 : f32
    %33 = vector.broadcast %cst_19 : f32 to vector<2x160xf32>
    %34 = arith.subf %33, %13 : vector<2x160xf32>
    %35 = arith.mulf %34, %13 : vector<2x160xf32>
    %36 = math.exp %35 : vector<2x160xf32>
    %37 = arith.mulf %32, %36 : vector<2x160xf32>
    %cst_20 = arith.constant 1.000000e+00 : f32
    %38 = vector.broadcast %cst_20 : f32 to vector<2x160xf32>
    %39 = arith.subf %38, %37 : vector<2x160xf32>
    %cst_21 = arith.constant 0.000000e+00 : f32
    %40 = vector.broadcast %cst_21 : f32 to vector<2x160xf32>
    %41 = arith.cmpf oge, %12, %40 : vector<2x160xf32>
    %cst_22 = arith.constant 0.000000e+00 : f32
    %42 = vector.broadcast %cst_22 : f32 to vector<2x160xf32>
    %43 = arith.subf %42, %39 : vector<2x160xf32>
    %44 = arith.select %41, %39, %43 : vector<2x160xi1>, vector<2x160xf32>
    %cst_23 = arith.constant 1.000000e+00 : f32
    %45 = vector.broadcast %cst_23 : f32 to vector<2x160xf32>
    %46 = arith.addf %45, %44 : vector<2x160xf32>
    %47 = arith.mulf %10, %46 : vector<2x160xf32>
    %c0_24 = arith.constant 0 : index
    %c0_25 = arith.constant 0 : index
    %c0_26 = arith.constant 0 : index
    %48 = vector.load %arg4[%c0_24, %c0_25, %c0_26] : memref<2x160x80xf32, #tpu.memory_space<vmem>>, vector<1x160x80xf32>
    %49 = vector.shape_cast %48 : vector<1x160x80xf32> to vector<160x80xf32>
    %cst_27 = arith.constant dense<0.000000e+00> : vector<2x80xf32>
    %50 = tpu.matmul %47, %49, %cst_27 {dimension_numbers = #tpu.dot_dimension_numbers<[1], [0], [0], [1], [0, 0, 1, 1], [], []>} : vector<2x160xf32>, vector<160x80xf32>, vector<2x80xf32> -> vector<2x80xf32>
    %51 = vector.broadcast %3 : vector<1x80xf32> to vector<2x80xf32>
    %52 = arith.addf %50, %51 : vector<2x80xf32>
    %c0_28 = arith.constant 0 : index
    %c0_29 = arith.constant 0 : index
    %c0_30 = arith.constant 0 : index
    %53 = vector.load %arg6[%c0_28, %c0_29, %c0_30] : memref<2x2x1xf32, #tpu.memory_space<vmem>>, vector<1x2x1xf32>
    %54 = vector.shape_cast %53 : vector<1x2x1xf32> to vector<2x1xf32>
    %55 = vector.extract_strided_slice %52 {offsets = [0, 0], sizes = [2, 64], strides = [1, 1]} : vector<2x80xf32> to vector<2x64xf32>
    %56 = vector.broadcast %54 : vector<2x1xf32> to vector<2x64xf32>
    %57 = arith.mulf %56, %55 : vector<2x64xf32>
    %58 = arith.addf %0, %57 : vector<2x64xf32>
    %c1 = arith.constant 1 : index
    %c0_31 = arith.constant 0 : index
    %c0_32 = arith.constant 0 : index
    %59 = vector.load %arg2[%c1, %c0_31, %c0_32] : memref<2x80x160xf32, #tpu.memory_space<vmem>>, vector<1x80x160xf32>
    %60 = vector.shape_cast %59 : vector<1x80x160xf32> to vector<80x160xf32>
    %cst_33 = arith.constant dense<0.000000e+00> : vector<2x160xf32>
    %61 = tpu.matmul %1, %60, %cst_33 {dimension_numbers = #tpu.dot_dimension_numbers<[1], [0], [0], [1], [0, 0, 1, 1], [], []>} : vector<2x80xf32>, vector<80x160xf32>, vector<2x160xf32> -> vector<2x160xf32>
    %62 = vector.broadcast %2 : vector<1x160xf32> to vector<2x160xf32>
    %63 = arith.addf %61, %62 : vector<2x160xf32>
    %cst_34 = arith.constant 5.000000e-01 : f32
    %64 = vector.broadcast %cst_34 : f32 to vector<2x160xf32>
    %65 = arith.mulf %64, %63 : vector<2x160xf32>
    %cst_35 = arith.constant 0.707106769 : f32
    %66 = vector.broadcast %cst_35 : f32 to vector<2x160xf32>
    %67 = arith.mulf %63, %66 : vector<2x160xf32>
    %68 = math.absf %67 : vector<2x160xf32>
    %cst_36 = arith.constant 0.327591091 : f32
    %69 = vector.broadcast %cst_36 : f32 to vector<2x160xf32>
    %70 = arith.mulf %69, %68 : vector<2x160xf32>
    %cst_37 = arith.constant 1.000000e+00 : f32
    %71 = vector.broadcast %cst_37 : f32 to vector<2x160xf32>
    %72 = arith.addf %71, %70 : vector<2x160xf32>
    %73 = tpu.reciprocal %72 {approx = true} : vector<2x160xf32> -> vector<2x160xf32>
    %cst_38 = arith.constant 1.06140542 : f32
    %74 = vector.broadcast %cst_38 : f32 to vector<2x160xf32>
    %75 = arith.mulf %74, %73 : vector<2x160xf32>
    %cst_39 = arith.constant 1.45315206 : f32
    %76 = vector.broadcast %cst_39 : f32 to vector<2x160xf32>
    %77 = arith.subf %75, %76 : vector<2x160xf32>
    %78 = arith.mulf %77, %73 : vector<2x160xf32>
    %cst_40 = arith.constant 1.42141378 : f32
    %79 = vector.broadcast %cst_40 : f32 to vector<2x160xf32>
    %80 = arith.addf %78, %79 : vector<2x160xf32>
    %81 = arith.mulf %80, %73 : vector<2x160xf32>
    %cst_41 = arith.constant 0.284496725 : f32
    %82 = vector.broadcast %cst_41 : f32 to vector<2x160xf32>
    %83 = arith.subf %81, %82 : vector<2x160xf32>
    %84 = arith.mulf %83, %73 : vector<2x160xf32>
    %cst_42 = arith.constant 0.254829586 : f32
    %85 = vector.broadcast %cst_42 : f32 to vector<2x160xf32>
    %86 = arith.addf %84, %85 : vector<2x160xf32>
    %87 = arith.mulf %86, %73 : vector<2x160xf32>
    %cst_43 = arith.constant 0.000000e+00 : f32
    %88 = vector.broadcast %cst_43 : f32 to vector<2x160xf32>
    %89 = arith.subf %88, %68 : vector<2x160xf32>
    %90 = arith.mulf %89, %68 : vector<2x160xf32>
    %91 = math.exp %90 : vector<2x160xf32>
    %92 = arith.mulf %87, %91 : vector<2x160xf32>
    %cst_44 = arith.constant 1.000000e+00 : f32
    %93 = vector.broadcast %cst_44 : f32 to vector<2x160xf32>
    %94 = arith.subf %93, %92 : vector<2x160xf32>
    %cst_45 = arith.constant 0.000000e+00 : f32
    %95 = vector.broadcast %cst_45 : f32 to vector<2x160xf32>
    %96 = arith.cmpf oge, %67, %95 : vector<2x160xf32>
    %cst_46 = arith.constant 0.000000e+00 : f32
    %97 = vector.broadcast %cst_46 : f32 to vector<2x160xf32>
    %98 = arith.subf %97, %94 : vector<2x160xf32>
    %99 = arith.select %96, %94, %98 : vector<2x160xi1>, vector<2x160xf32>
    %cst_47 = arith.constant 1.000000e+00 : f32
    %100 = vector.broadcast %cst_47 : f32 to vector<2x160xf32>
    %101 = arith.addf %100, %99 : vector<2x160xf32>
    %102 = arith.mulf %65, %101 : vector<2x160xf32>
    %c1_48 = arith.constant 1 : index
    %c0_49 = arith.constant 0 : index
    %c0_50 = arith.constant 0 : index
    %103 = vector.load %arg4[%c1_48, %c0_49, %c0_50] : memref<2x160x80xf32, #tpu.memory_space<vmem>>, vector<1x160x80xf32>
    %104 = vector.shape_cast %103 : vector<1x160x80xf32> to vector<160x80xf32>
    %cst_51 = arith.constant dense<0.000000e+00> : vector<2x80xf32>
    %105 = tpu.matmul %102, %104, %cst_51 {dimension_numbers = #tpu.dot_dimension_numbers<[1], [0], [0], [1], [0, 0, 1, 1], [], []>} : vector<2x160xf32>, vector<160x80xf32>, vector<2x80xf32> -> vector<2x80xf32>
    %106 = vector.broadcast %3 : vector<1x80xf32> to vector<2x80xf32>
    %107 = arith.addf %105, %106 : vector<2x80xf32>
    %c1_52 = arith.constant 1 : index
    %c0_53 = arith.constant 0 : index
    %c0_54 = arith.constant 0 : index
    %108 = vector.load %arg6[%c1_52, %c0_53, %c0_54] : memref<2x2x1xf32, #tpu.memory_space<vmem>>, vector<1x2x1xf32>
    %109 = vector.shape_cast %108 : vector<1x2x1xf32> to vector<2x1xf32>
    %110 = vector.extract_strided_slice %107 {offsets = [0, 0], sizes = [2, 64], strides = [1, 1]} : vector<2x80xf32> to vector<2x64xf32>
    %111 = vector.broadcast %109 : vector<2x1xf32> to vector<2x64xf32>
    %112 = arith.mulf %111, %110 : vector<2x64xf32>
    %113 = arith.addf %58, %112 : vector<2x64xf32>
    %c0_55 = arith.constant 0 : index
    %c0_56 = arith.constant 0 : index
    %114 = vector.load %arg7[%c0_55, %c0_56] : memref<2x64xf32, #tpu.memory_space<vmem>>, vector<2x64xf32>
    tpu.vector_store %arg7[%c0_55, %c0_56], %113 {strides = array<i32>} : memref<2x64xf32, #tpu.memory_space<vmem>>, vector<2x64xf32>,
    return
  }
}

</mosaic_0001>

<bundles_post_ra>
// kernel: times_block.1
= control target key start
LH: loop header
LB: loop body
LE: loop exit
PB: predicated region body
PF: predicated region fallthrough
CT: control target
= control target key end

     0   :  { %v723_v3 = vmov 0.0   ;;  %vm61_vm0 = vcmask 654336   ;;  %vm214_vm5 = vcmask 261120   ;;  %vm543_vm6 = vcmask 517120   ;;  %s1079_s2 = inlined_call_operand.vmem [shape: f32[2,80,160], index: 2, kind: input, shape index: {}]   ;;  %s1080_s1 = inlined_call_operand.vmem [shape: f32[2,80], index: 1, kind: input, shape index: {}]   ;;  %s1081_s4 = inlined_call_operand.vmem [shape: f32[2,160,80], index: 4, kind: input, shape index: {}]   ;;  %s1082_s6 = inlined_call_operand.vmem [shape: f32[2,2,1], index: 6, kind: input, shape index: {}]   ;;  %s1083_s3 = inlined_call_operand.vmem [shape: f32[1,160], index: 3, kind: input, shape index: {}]   ;;  %s1084_s5 = inlined_call_operand.vmem [shape: f32[1,80], index: 5, kind: input, shape index: {}]   ;;  %s1085_s0 = inlined_call_operand.vmem [shape: f32[2,64], index: 0, kind: input, shape index: {}]   ;;  %s1086_s7 = inlined_call_operand.vmem [shape: f32[2,64], index: 7, kind: output, shape index: {}]  }
   0x1   :  { %v31_v0 = vld [vmem:[%s1079_s2 + $0x8] sm:$0xff]  ;;  %v33_v1 = vld [vmem:[%s1079_s2 + $0x18] sm:$0xff]  ;;  %129 = vmatprep.mubr.f32.mxu1 %v723_v3  ;;  %381 = vmatprep.mubr.f32.mxu0 %v723_v3  ;;  %v30_v6 = vld [vmem:[%s1079_s2] sm:$0xff]  ;;  %v724_v3 = vmov 0.0|0.0  }
   0x2   :  { %v557_v2 = vld [vmem:[%s1079_s2 + $0xa8] sm:$0xff]  ;;  %v603_v4 = vpack.c.bf16 %v33_v1, %v31_v0  ;;  %v559_v5 = vld [vmem:[%s1079_s2 + $0xb8] sm:$0xff]  ;;  %v32_v7 = vld [vmem:[%s1079_s2 + $0x10] sm:$0xff] }
   0x3   :  { %v653_v8 = vpack.c.bf16 %v559_v5, %v557_v2  ;;  %v605_v9 = vpack.c.bf16 %v32_v7, %v30_v6  ;;  %v556_v10 = vld [vmem:[%s1079_s2 + $0xa0] sm:$0xff]  ;;  %v558_v11 = vld [vmem:[%s1079_s2 + $0xb0] sm:$0xff]  ;;  %v35_v12 = vld [vmem:[%s1079_s2 + $0x28] sm:$0xff] }
   0x4   :  { %604 = vmatprep.subr.bf16.mxu1 %v603_v4  ;;  %v655_v13 = vpack.c.bf16 %v558_v11, %v556_v10  ;;  %v37_v14 = vld [vmem:[%s1079_s2 + $0x38] sm:$0xff]  ;;  %v561_v15 = vld [vmem:[%s1079_s2 + $0xc8] sm:$0xff]  ;;  %v34_v19 = vld [vmem:[%s1079_s2 + $0x20] sm:$0xff] }
   0x5   :  { %v563_v16 = vld [vmem:[%s1079_s2 + $0xd8] sm:$0xff]  ;;  %654 = vmatprep.subr.bf16.mxu0 %v653_v8  ;;  %606 = vmatpush1.bf16.msra.mxu1 %v605_v9  ;;  %v607_v17 = vpack.c.bf16 %v37_v14, %v35_v12  ;;  %v36_v20 = vld [vmem:[%s1079_s2 + $0x30] sm:$0xff]  ;;  %v560_v21 = vld [vmem:[%s1079_s2 + $0xc0] sm:$0xff] }
   0x6   :  { %v657_v18 = vpack.c.bf16 %v563_v16, %v561_v15  ;;  %656 = vmatpush1.bf16.msra.mxu0 %v655_v13  ;;  %v609_v22 = vpack.c.bf16 %v36_v20, %v34_v19  ;;  %v562_v23 = vld [vmem:[%s1079_s2 + $0xd0] sm:$0xff]  ;;  %v39_v24 = vld [vmem:[%s1079_s2 + $0x48] sm:$0xff]  ;;  %v41_v25 = vld [vmem:[%s1079_s2 + $0x58] sm:$0xff] }
   0x7   :  { %608 = vmatprep.subr.bf16.mxu1 %v607_v17  ;;  %v659_v26 = vpack.c.bf16 %v562_v23, %v560_v21  ;;  %v611_v27 = vpack.c.bf16 %v41_v25, %v39_v24  ;;  %v565_v28 = vld [vmem:[%s1079_s2 + $0xe8] sm:$0xff]  ;;  %v567_v29 = vld [vmem:[%s1079_s2 + $0xf8] sm:$0xff]  ;;  %v38_v30 = vld [vmem:[%s1079_s2 + $0x40] sm:$0xff] }
   0x8   :  { %658 = vmatprep.subr.bf16.mxu0 %v657_v18  ;;  %v661_v31 = vpack.c.bf16 %v567_v29, %v565_v28  ;;  %v40_v32 = vld [vmem:[%s1079_s2 + $0x50] sm:$0xff]  ;;  %v564_v33 = vld [vmem:[%s1079_s2 + $0xe0] sm:$0xff]  ;;  %v43_v36 = vld [vmem:[%s1079_s2 + $0x68] sm:$0xff] }
   0x9   :  { %v566_v34 = vld [vmem:[%s1079_s2 + $0xf0] sm:$0xff]  ;;  %610 = vmatpush1.bf16.msra.mxu1 %v609_v22  ;;  %v613_v35 = vpack.c.bf16 %v40_v32, %v38_v30  ;;  %v45_v37 = vld [vmem:[%s1079_s2 + $0x78] sm:$0xff]  ;;  %v569_v38 = vld [vmem:[%s1079_s2 + $0x108] sm:$0xff] }
   0xa   :  { %660 = vmatpush1.bf16.msra.mxu0 %v659_v26  ;;  %612 = vmatprep.subr.bf16.mxu1 %v611_v27  ;;  %v663_v39 = vpack.c.bf16 %v566_v34, %v564_v33  ;;  %v615_v40 = vpack.c.bf16 %v45_v37, %v43_v36  ;;  %v571_v41 = vld [vmem:[%s1079_s2 + $0x118] sm:$0xff]  ;;  %v42_v42 = vld [vmem:[%s1079_s2 + $0x60] sm:$0xff]  ;;  %v44_v43 = vld [vmem:[%s1079_s2 + $0x70] sm:$0xff] }
   0xb   :  { %662 = vmatprep.subr.bf16.mxu0 %v661_v31  ;;  %v665_v44 = vpack.c.bf16 %v571_v41, %v569_v38  ;;  %v568_v45 = vld [vmem:[%s1079_s2 + $0x100] sm:$0xff]  ;;  %v570_v46 = vld [vmem:[%s1079_s2 + $0x110] sm:$0xff]  ;;  %v47_v47 = vld [vmem:[%s1079_s2 + $0x88] sm:$0xff]  ;;  %v617_v51 = vpack.c.bf16 %v44_v43, %v42_v42 }
   0xc   :  { %v49_v48 = vld [vmem:[%s1079_s2 + $0x98] sm:$0xff]  ;;  %v573_v49 = vld [vmem:[%s1079_s2 + $0x128] sm:$0xff]  ;;  %v667_v52 = vpack.c.bf16 %v570_v46, %v568_v45  ;;  %v46_v54 = vld [vmem:[%s1079_s2 + $0x80] sm:$0xff] }
   0xd   :  { %v575_v50 = vld [vmem:[%s1079_s2 + $0x138] sm:$0xff]  ;;  %614 = vmatpush1.bf16.msra.mxu1 %v613_v35  ;;  %v619_v53 = vpack.c.bf16 %v49_v48, %v47_v47  ;;  %v48_v55 = vld [vmem:[%s1079_s2 + $0x90] sm:$0xff]  ;;  %v572_v57 = vld [vmem:[%s1079_s2 + $0x120] sm:$0xff] }
   0xe   :  { %664 = vmatpush1.bf16.msra.mxu0 %v663_v39  ;;  %616 = vmatprep.subr.bf16.mxu1 %v615_v40  ;;  %v669_v56 = vpack.c.bf16 %v575_v50, %v573_v49  ;;  %v574_v58 = vld [vmem:[%s1079_s2 + $0x130] sm:$0xff]  ;;  %v621_v59 = vpack.c.bf16 %v48_v55, %v46_v54  ;;  %v27_v61 = vld [vmem:[%s1080_s1] sm:$0x3]  ;;  %v189_v63 = vld [vmem:[%s1081_s4 + $0x8] sm:$0xff] }
   0xf   :  { %666 = vmatprep.subr.bf16.mxu0 %v665_v44  ;;  %v671_v60 = vpack.c.bf16 %v574_v58, %v572_v57  ;;  %v188_v62 = vld [vmem:[%s1081_s4] sm:$0xff]  ;;  %v582_v2 = vld [vmem:[%s1081_s4 + $0xa8] sm:$0xff]  ;;  %v190_v5 = vld [vmem:[%s1081_s4 + $0x10] sm:$0xff] }
  0x10   :  { %v581_v0 = vld [vmem:[%s1081_s4 + $0xa0] sm:$0xff]  ;;  %v624_v1 = vpack.c.bf16 %v189_v63, %v188_v62  ;;  %v191_v6 = vld [vmem:[%s1081_s4 + $0x18] sm:$0xff]  ;;  %v583_v7 = vld [vmem:[%s1081_s4 + $0xb0] sm:$0xff]  ;;  %v51_v62 = vlaneseq }
  0x11   :  { %618 = vmatpush1.bf16.msra.mxu1 %v617_v51  ;;  %v674_v4 = vpack.c.bf16 %v582_v2, %v581_v0  ;;  %v627_v8 = vpack.c.bf16 %v191_v6, %v190_v5  ;;  %v584_v9 = vld [vmem:[%s1081_s4 + $0xb8] sm:$0xff]  ;;  %v192_v11 = vld [vmem:[%s1081_s4 + $0x20] sm:$0xff]  ;;  %v193_v12 = vld [vmem:[%s1081_s4 + $0x28] sm:$0xff] }
  0x12   :  { %668 = vmatpush1.bf16.msra.mxu0 %v667_v52  ;;  %620 = vmatprep.subr.bf16.mxu1 %v619_v53  ;;  %v677_v10 = vpack.c.bf16 %v584_v9, %v583_v7  ;;  %v585_v13 = vld [vmem:[%s1081_s4 + $0xc0] sm:$0xff]  ;;  %v630_v14 = vpack.c.bf16 %v193_v12, %v192_v11  ;;  %v586_v15 = vld [vmem:[%s1081_s4 + $0xc8] sm:$0xff]  ;;  %v194_v17 = vld [vmem:[%s1081_s4 + $0x30] sm:$0xff]  ;;  %v52_v63 = vshrl.u32 %v51_v62, 7 }
  0x13   :  { %670 = vmatprep.subr.bf16.mxu0 %v669_v56  ;;  %v680_v16 = vpack.c.bf16 %v586_v15, %v585_v13  ;;  %v195_v18 = vld [vmem:[%s1081_s4 + $0x38] sm:$0xff]  ;;  %v587_v19 = vld [vmem:[%s1081_s4 + $0xd0] sm:$0xff]  ;;  %v196_v23 = vld [vmem:[%s1081_s4 + $0x40] sm:$0xff] }
  0x14   :  { %v633_v20 = vpack.c.bf16 %v195_v18, %v194_v17  ;;  %v588_v21 = vld [vmem:[%s1081_s4 + $0xd8] sm:$0xff]  ;;  %v197_v24 = vld [vmem:[%s1081_s4 + $0x48] sm:$0xff]  ;;  %v589_v25 = vld [vmem:[%s1081_s4 + $0xe0] sm:$0xff]  ;;  %v53_v0 = vsub.s32 0, %v52_v63  ;;  %v57_v2 = vsub.s32 1, %v52_v63 }
  0x15   :  { %622 = vmatpush1.bf16.msra.mxu1 %v621_v59  ;;  %v683_v22 = vpack.c.bf16 %v588_v21, %v587_v19  ;;  %v636_v26 = vpack.c.bf16 %v197_v24, %v196_v23  ;;  %v590_v27 = vld [vmem:[%s1081_s4 + $0xe8] sm:$0xff]  ;;  %v198_v29 = vld [vmem:[%s1081_s4 + $0x50] sm:$0xff]  ;;  %v199_v30 = vld [vmem:[%s1081_s4 + $0x58] sm:$0xff]  ;;  %v725_v59 = vmov 0  }
  0x16   :  { %672 = vmatpush1.bf16.msra.mxu0 %v671_v60  ;;  %623 = vmatprep.subr.bf16.mxu1 %v724_v3  ;;  %v686_v28 = vpack.c.bf16 %v590_v27, %v589_v25  ;;  %v591_v31 = vld [vmem:[%s1081_s4 + $0xf0] sm:$0xff]  ;;  %v639_v32 = vpack.c.bf16 %v199_v30, %v198_v29  ;;  %v592_v33 = vld [vmem:[%s1081_s4 + $0xf8] sm:$0xff]  ;;  %v200_v35 = vld [vmem:[%s1081_s4 + $0x60] sm:$0xff] }
  0x17   :  { %673 = vmatprep.subr.bf16.mxu0 %v724_v3  ;;  %v689_v34 = vpack.c.bf16 %v592_v33, %v591_v31  ;;  %v201_v36 = vld [vmem:[%s1081_s4 + $0x68] sm:$0xff]  ;;  %v593_v37 = vld [vmem:[%s1081_s4 + $0x100] sm:$0xff]  ;;  %v202_v41 = vld [vmem:[%s1081_s4 + $0x70] sm:$0xff]  ;;  %706 = vset.pattern.permute.xlu0 %v725_v59 }
  0x18   :  { %549 = vmatmul.mubr.msk.f32.vlgmr.msra.gmra.mrb[0].mxu1 %vm61_vm0, %v27_v61  ;;  %v642_v38 = vpack.c.bf16 %v201_v36, %v200_v35  ;;  %v594_v39 = vld [vmem:[%s1081_s4 + $0x108] sm:$0xff]  ;;  %v203_v42 = vld [vmem:[%s1081_s4 + $0x78] sm:$0xff]  ;;  %v595_v43 = vld [vmem:[%s1081_s4 + $0x110] sm:$0xff] }
  0x19   :  { %576 = vmatmul.mubr.msk.f32.vlgmr.msra.gmra.mrb[0].mxu0 %vm61_vm0, %v27_v61  ;;  %625 = vmatpush1.bf16.msra.mxu1 %v624_v1  ;;  %v692_v40 = vpack.c.bf16 %v594_v39, %v593_v37  ;;  %v645_v44 = vpack.c.bf16 %v203_v42, %v202_v41  ;;  %v596_v45 = vld [vmem:[%s1081_s4 + $0x118] sm:$0xff]  ;;  %v204_v47 = vld [vmem:[%s1081_s4 + $0x80] sm:$0xff]  ;;  %v205_v48 = vld [vmem:[%s1081_s4 + $0x88] sm:$0xff] }
  0x1a   :  { %675 = vmatpush1.bf16.msra.mxu0 %v674_v4  ;;  %626 = vmatprep.subr.bf16.mxu1 %v724_v3  ;;  %v695_v46 = vpack.c.bf16 %v596_v45, %v595_v43  ;;  %v597_v49 = vld [vmem:[%s1081_s4 + $0x120] sm:$0xff]  ;;  %v648_v50 = vpack.c.bf16 %v205_v48, %v204_v47  ;;  %v598_v51 = vld [vmem:[%s1081_s4 + $0x128] sm:$0xff]  ;;  %v206_v53 = vld [vmem:[%s1081_s4 + $0x90] sm:$0xff] }
  0x1b   :  { %676 = vmatprep.subr.bf16.mxu0 %v724_v3  ;;  %v698_v52 = vpack.c.bf16 %v598_v51, %v597_v49  ;;  %v207_v54 = vld [vmem:[%s1081_s4 + $0x98] sm:$0xff]  ;;  %v599_v55 = vld [vmem:[%s1081_s4 + $0x130] sm:$0xff]  ;;  %v288_v60 = vld [vmem:[%s1082_s6] sm:$0x3] }
  0x1c   :  { %v651_v56 = vpack.c.bf16 %v207_v54, %v206_v53  ;;  %v600_v57 = vld [vmem:[%s1081_s4 + $0x138] sm:$0xff]  ;;  %291 = vperm.xlu0 %706, %v288_v60   ;;  %v602_v61 = vld [vmem:[%s1082_s6 + $0x2] sm:$0x3]  ;;  %v28_v1 = vld [vmem:[%s1083_s3] sm:$0x3] }
  0x1d   :  { %628 = vmatpush1.bf16.msra.mxu1 %v627_v8  ;;  %v701_v58 = vpack.c.bf16 %v600_v57, %v599_v55  ;;  %v58_v4 = vrot.slane %v28_v1, %v57_v2 }
  0x1e   :  { %678 = vmatpush1.bf16.msra.mxu0 %v677_v10  ;;  %629 = vmatprep.subr.bf16.mxu1 %v724_v3 }
  0x1f   :  { %679 = vmatprep.subr.bf16.mxu0 %v724_v3 }
  0x20   :  { %538 = vperm.xlu0 %706, %v602_v61  }
  0x21   :  { %631 = vmatpush1.bf16.msra.mxu1 %v630_v14 }
  0x22   :  { %681 = vmatpush1.bf16.msra.mxu0 %v680_v16  ;;  %632 = vmatprep.subr.bf16.mxu1 %v724_v3 }
  0x23   :  { %682 = vmatprep.subr.bf16.mxu0 %v724_v3 }
  0x25   :  { %634 = vmatpush1.bf16.msra.mxu1 %v633_v20 }
  0x26   :  { %684 = vmatpush1.bf16.msra.mxu0 %v683_v22  ;;  %635 = vmatprep.subr.bf16.mxu1 %v724_v3 }
  0x27   :  { %685 = vmatprep.subr.bf16.mxu0 %v724_v3 }
  0x29   :  { %637 = vmatpush1.bf16.msra.mxu1 %v636_v26 }
  0x2a   :  { %687 = vmatpush1.bf16.msra.mxu0 %v686_v28  ;;  %638 = vmatprep.subr.bf16.mxu1 %v724_v3 }
  0x2b   :  { %688 = vmatprep.subr.bf16.mxu0 %v724_v3 }
  0x2d   :  { %640 = vmatpush1.bf16.msra.mxu1 %v639_v32 }
  0x2e   :  { %690 = vmatpush1.bf16.msra.mxu0 %v689_v34  ;;  %641 = vmatprep.subr.bf16.mxu1 %v724_v3 }
  0x2f   :  { %691 = vmatprep.subr.bf16.mxu0 %v724_v3 }
  0x31   :  { %643 = vmatpush1.bf16.msra.mxu1 %v642_v38 }
  0x32   :  { %693 = vmatpush1.bf16.msra.mxu0 %v692_v40  ;;  %644 = vmatprep.subr.bf16.mxu1 %v724_v3 }
  0x33   :  { %694 = vmatprep.subr.bf16.mxu0 %v724_v3 }
  0x35   :  { %646 = vmatpush1.bf16.msra.mxu1 %v645_v44 }
  0x36   :  { %696 = vmatpush1.bf16.msra.mxu0 %v695_v46  ;;  %647 = vmatprep.subr.bf16.mxu1 %v724_v3 }
  0x37   :  { %697 = vmatprep.subr.bf16.mxu0 %v724_v3 }
  0x39   :  { %649 = vmatpush1.bf16.msra.mxu1 %v648_v50 }
  0x3a   :  { %699 = vmatpush1.bf16.msra.mxu0 %v698_v52  ;;  %650 = vmatprep.subr.bf16.mxu1 %v724_v3 }
  0x3b   :  { %700 = vmatprep.subr.bf16.mxu0 %v724_v3  ;;  %v54_v3 = vrot.slane %v28_v1, %v53_v0 }
  0x3d   :  { %652 = vmatpush1.bf16.msra.mxu1 %v651_v56 }
  0x3e   :  { %702 = vmatpush1.bf16.msra.mxu0 %v701_v58 }
  0xeb   :  { %v131_v5 = vpop.f32.mrb[0].mxu1 }
  0xec   :  { %v1038_v6 = vadd.f32 %v131_v5, %v54_v3  ;;  %v383_v7 = vpop.f32.mrb[0].mxu0  ;;  %v133_v8 = vpop.f32.mrb[1].mxu1 }
  0xed   :  { %v1040_v9 = vadd.f32 %v383_v7, %v54_v3  ;;  %v1042_v10 = vadd.f32 %v133_v8, %v58_v4  ;;  %v385_v11 = vpop.f32.mrb[1].mxu0 }
  0xee   :  { %v1045_v12 = vmul.f32 0.70710677, %v1038_v6  ;;  %v1047_v13 = vadd.f32 %v385_v11, %v58_v4 }
  0xef   :  { %v1050_v14 = vmul.f32 0.70710677, %v1040_v9  ;;  %v1053_v15 = vmul.f32 0.70710677, %v1042_v10 }
  0xf0   :  { %v140_v16 = vand.u32 2147483647, %v1045_v12  ;;  %v1057_v17 = vmul.f32 0.70710677, %v1047_v13  ;;  %vm178_vm1 = vcmp.ge.f32.partialorder %v1045_v12, 0.0  ;;  %v136_v12 = vmul.f32 0.5, %v1038_v6 }
  0xf1   :  { %v392_v18 = vand.u32 2147483647, %v1050_v14  ;;  %v141_v19 = vand.u32 2147483647, %v1053_v15  ;;  %vm430_vm2 = vcmp.ge.f32.partialorder %v1050_v14, 0.0  ;;  %vm179_vm3 = vcmp.ge.f32.partialorder %v1053_v15, 0.0 }
  0xf2   :  { %v142_v20 = vmul.f32 0.3275911, %v140_v16  ;;  %v393_v21 = vand.u32 2147483647, %v1057_v17  ;;  %v166_v29 = vsub.f32 0.0, %v140_v16  ;;  %vm431_vm4 = vcmp.ge.f32.partialorder %v1057_v17, 0.0 }
  0xf3   :  { %v394_v22 = vmul.f32 0.3275911, %v392_v18  ;;  %v143_v23 = vmul.f32 0.3275911, %v141_v19  ;;  %v418_v30 = vsub.f32 0.0, %v392_v18  ;;  %v167_v33 = vsub.f32 0.0, %v141_v19 }
  0xf4   :  { %v144_v24 = vadd.f32 1.0, %v142_v20  ;;  %v395_v25 = vmul.f32 0.3275911, %v393_v21  ;;  %v168_v32 = vmul.f32 %v166_v29, %v140_v16  ;;  %v419_v38 = vsub.f32 0.0, %v393_v21  ;;  %v554_v6 = vld [vmem:[%s1084_s5] ss:$0 sm:$0xff] }
  0xf5   :  { %v396_v26 = vadd.f32 1.0, %v394_v22  ;;  %v145_v27 = vadd.f32 1.0, %v143_v23  ;;  %v420_v36 = vmul.f32 %v418_v30, %v392_v18  ;;  %v169_v43 = vmul.f32 %v167_v33, %v141_v19 }
  0xf6   :  { %707 = vrcp.f32 %v144_v24  ;;  %v397_v28 = vadd.f32 1.0, %v395_v25  ;;  %v170_v41 = vmul.f32 1.442695, %v168_v32  ;;  %v421_v49 = vmul.f32 %v419_v38, %v393_v21 }
  0xf7   :  { %709 = vrcp.f32 %v396_v26  ;;  %v422_v45 = vmul.f32 1.442695, %v420_v36  ;;  %v172_v54 = vmul.f32 1.442695, %v169_v43  ;;  %v389_v14 = vmul.f32 0.5, %v1047_v13 }
  0xf8   :  { %711 = vrcp.f32 %v145_v27  ;;  %v424_v59 = vmul.f32 1.442695, %v421_v49  ;;  %v388_v15 = vmul.f32 0.5, %v1040_v9  ;;  %v26_v13 = vld [vmem:[%s1085_s0] sm:$0x3] }
  0xf9   :  { %713 = vrcp.f32 %v397_v28 }
  0xfa   :  { %715 = vpow2.f32 %v170_v41 }
  0xfb   :  { %717 = vpow2.f32 %v422_v45  ;;  %v137_v45 = vmul.f32 0.5, %v1042_v10  ;;  %v292_v10 = vpop.permute.xlu0 %291 }
  0xfc   :  { %719 = vpow2.f32 %v172_v54 }
  0xfd   :  { %721 = vpow2.f32 %v424_v59 }
  0xff   :  { %v539_v59 = vpop.permute.xlu0 %538 }
 0x100   :  { %v708_v31 = vpop.eup %707 }
 0x101   :  { %v710_v34 = vpop.eup %709  ;;  %v148_v35 = vmul.f32 1.0614054, %v708_v31 }
 0x102   :  { %v400_v37 = vmul.f32 1.0614054, %v710_v34  ;;  %v712_v40 = vpop.eup %711 }
 0x103   :  { %v550_v39 = vadd.f32 -1.4531521, %v148_v35  ;;  %v149_v46 = vmul.f32 1.0614054, %v712_v40  ;;  %v714_v47 = vpop.eup %713 }
 0x104   :  { %v577_v42 = vadd.f32 -1.4531521, %v400_v37  ;;  %v401_v52 = vmul.f32 1.0614054, %v714_v47  ;;  %v716_v19 = vpop.eup %715 }
 0x105   :  { %v152_v44 = vmul.f32 %v708_v31, %v550_v39  ;;  %v551_v51 = vadd.f32 -1.4531521, %v149_v46  ;;  %v718_v21 = vpop.eup %717 }
 0x106   :  { %v404_v48 = vmul.f32 %v710_v34, %v577_v42  ;;  %v578_v57 = vadd.f32 -1.4531521, %v401_v52  ;;  %v720_v29 = vpop.eup %719 }
 0x107   :  { %v154_v50 = vadd.f32 1.4214138, %v152_v44  ;;  %v153_v56 = vmul.f32 %v712_v40, %v551_v51  ;;  %v722_v36 = vpop.eup %721 }
 0x108   :  { %v406_v53 = vadd.f32 1.4214138, %v404_v48  ;;  %v405_v62 = vmul.f32 %v714_v47, %v578_v57 }
 0x109   :  { %v156_v55 = vmul.f32 %v708_v31, %v154_v50  ;;  %v155_v61 = vadd.f32 1.4214138, %v153_v56 }
 0x10a   :  { %v408_v58 = vmul.f32 %v710_v34, %v406_v53  ;;  %v407_v2 = vadd.f32 1.4214138, %v405_v62 }
 0x10b   :  { %v552_v60 = vadd.f32 -0.28449672, %v156_v55  ;;  %v157_v1 = vmul.f32 %v712_v40, %v155_v61 }
 0x10c   :  { %v579_v63 = vadd.f32 -0.28449672, %v408_v58  ;;  %v409_v7 = vmul.f32 %v714_v47, %v407_v2 }
 0x10d   :  { %v160_v0 = vmul.f32 %v708_v31, %v552_v60  ;;  %v553_v5 = vadd.f32 -0.28449672, %v157_v1 }
 0x10e   :  { %v412_v3 = vmul.f32 %v710_v34, %v579_v63  ;;  %v580_v18 = vadd.f32 -0.28449672, %v409_v7 }
 0x10f   :  { %v162_v4 = vadd.f32 0.2548296, %v160_v0  ;;  %v161_v16 = vmul.f32 %v712_v40, %v553_v5 }
 0x110   :  { %v414_v8 = vadd.f32 0.2548296, %v412_v3  ;;  %v413_v24 = vmul.f32 %v714_v47, %v580_v18 }
 0x111   :  { %v164_v11 = vmul.f32 %v708_v31, %v162_v4  ;;  %v163_v23 = vadd.f32 0.2548296, %v161_v16 }
 0x112   :  { %v416_v20 = vmul.f32 %v710_v34, %v414_v8  ;;  %v415_v28 = vadd.f32 0.2548296, %v413_v24 }
 0x113   :  { %v174_v22 = vmul.f32 %v716_v19, %v164_v11  ;;  %v165_v27 = vmul.f32 %v712_v40, %v163_v23 }
 0x114   :  { %v426_v25 = vmul.f32 %v718_v21, %v416_v20  ;;  %v417_v35 = vmul.f32 %v714_v47, %v415_v28 }
 0x115   :  { %v176_v26 = vsub.f32 1.0, %v174_v22  ;;  %v175_v33 = vmul.f32 %v720_v29, %v165_v27 }
 0x116   :  { %v428_v30 = vsub.f32 1.0, %v426_v25  ;;  %v427_v38 = vmul.f32 %v722_v36, %v417_v35 }
 0x117   :  { %v180_v32 = vsub.f32 0.0, %v176_v26  ;;  %v177_v31 = vsub.f32 1.0, %v175_v33 }
 0x118   :  { %v432_v37 = vsub.f32 0.0, %v428_v30  ;;  %v429_v41 = vsub.f32 1.0, %v427_v38 }
 0x119   :  { %v182_v34 = vsel %vm178_vm1, %v176_v26, %v180_v32  ;;  %v181_v39 = vsub.f32 0.0, %v177_v31 }
 0x11a   :  { %v434_v42 = vsel %vm430_vm2, %v428_v30, %v432_v37  ;;  %v184_v40 = vadd.f32 1.0, %v182_v34  ;;  %v433_v44 = vsub.f32 0.0, %v429_v41 }
 0x11b   :  { %v183_v43 = vsel %vm179_vm3, %v177_v31, %v181_v39  ;;  %v436_v47 = vadd.f32 1.0, %v434_v42 }
 0x11c   :  { %v185_v46 = vadd.f32 1.0, %v183_v43  ;;  %v435_v48 = vsel %vm431_vm4, %v429_v41, %v433_v44  ;;  %v186_v51 = vmul.f32 %v184_v40, %v136_v12 }
 0x11d   :  { %v437_v50 = vadd.f32 1.0, %v435_v48  ;;  %v438_v53 = vmul.f32 %v436_v47, %v388_v15 }
 0x11e   :  { %v187_v49 = vmul.f32 %v185_v46, %v137_v45 }
 0x11f   :  { %v439_v52 = vmul.f32 %v437_v50, %v389_v14 }
 0x120   :  { %555 = vmatprep.mubr.msk.f32.mxu1 %vm214_vm5, %v187_v49 }
 0x121   :  { %283 = vmatmul.mubr.f32.vlgmr.msra.gmra.mrb[2].mxu1 %v186_v51  ;;  %601 = vmatprep.mubr.msk.f32.mxu0 %vm214_vm5, %v439_v52 }
 0x122   :  { %529 = vmatmul.mubr.f32.vlgmr.msra.gmra.mrb[2].mxu0 %v438_v53 }
 0x1f4   :  { %v284_v17 = vpop.f32.mrb[2].mxu1 }
 0x1f5   :  { %v285_v54 = vadd.f32 %v554_v6, %v284_v17  ;;  %v286_v55 = vpop.f32.mrb[3].mxu1  ;;  %v530_v56 = vpop.f32.mrb[2].mxu0 }
 0x1f6   :  { %v531_v57 = vadd.f32 %v554_v6, %v530_v56  ;;  %v532_v58 = vpop.f32.mrb[3].mxu0 }
 0x1f7   :  { %v294_v9 = vmul.f32 %v292_v10, %v285_v54 }
 0x1f8   :  { %v541_v61 = vmul.f32 %v539_v59, %v531_v57 }
 0x1f9   :  { %v295_v60 = vadd.f32 %v294_v9, %v26_v13 }
 0x1fb   :  { %v542_v62 = vadd.f32 %v541_v61, %v295_v60 }
 0x1fd   :  { %544 = vst.msk [vmem:[%s1086_s7] sm:$0x3] %vm543_vm6, %v542_v62 }

</bundles_post_ra>
